<compile_context>
chip_gen: v5e
topology: v5e:2x2
jax: 0.10.0
libtpu: 0.0.40
codegen_flags: <defaults>
</compile_context>

<pallas_src>
import functools

import jax
import jax.numpy as jnp
from jax.experimental import pallas as pl
from jax.experimental.pallas import tpu as pltpu


def _round_up(n, m):
    return ((n + m - 1) // m) * m


def _qnetwork_kernel(x_ref, p_ref, out_ref, *, input_dim, output_dim, bias_row, precision):
    """One batch tile: out = relu(relu(x@W1+b1)@W2+b2)@W3+b3.

    p_ref is the packed (3, bias_row+8, C) parameter buffer (C = 128-lane padded).
    Slab l holds layer l's weight in rows [0, fan_in), zero elsewhere, and its bias
    in row `bias_row` (sublane-aligned).  Matmuls accumulate in f32 on the MXU;
    bias-add / ReLU run in f32 on the VPU.  Zero-padded weight columns keep every
    intermediate activation exactly zero in its padded lanes, so layers 2/3 can
    matmul the full lane-padded (tb, C) activation against the full (C, C) slice
    with no masked loads or relayouts.
    """
    f32 = jnp.float32
    n_layers = p_ref.shape[0]
    cols = p_ref.shape[2]

    h = x_ref[...].astype(f32)                      # (tb, input_dim), cast on VPU in-kernel

    for layer in range(n_layers):
        slab = p_ref[layer]                         # (bias_row + 8, cols), VMEM-resident
        # Layer 0 contracts over the raw input_dim (lane-dense (input_dim, cols) view,
        # avoids padding x); later layers contract over the full lane-padded width.
        rows = input_dim if layer == 0 else cols
        w = slab[:rows, :].astype(f32)
        b = slab[bias_row:bias_row + 1, :].astype(f32)   # (1, cols) bias row, fixed offset
        y = jnp.dot(h, w, preferred_element_type=f32, precision=precision) + b
        h = jnp.maximum(y, 0.0) if layer + 1 < n_layers else y   # ReLU on hidden layers

    # Masked store of the exact (tb, output_dim) result (output_dim=2 -> vst.msk);
    # lane-dense alternative would write 64x more HBM bytes.
    out_ref[...] = h[:, :output_dim].astype(out_ref.dtype)


def pack_qnetwork_params(params, dtype=jnp.float32):
    """Pack (w1, b1, w2, b2, w3, b3) into one lane-aligned, zero-padded (3, R, C) buffer.

    Weights are stored (fan_in, fan_out) so the kernel computes y = x @ W + b
    (equivalent to PyTorch's x @ W_pt.T + b).  C is padded to a multiple of 128
    lanes; the bias of every layer sits at the fixed sublane-aligned row `bias_row`.
    One parameter DMA per pallas_call replaces six.
    dtype=jnp.float32 is the recommended default (esp. v5e); bf16 is optional.
    """
    w1, b1, w2, b2, w3, b3 = params
    input_dim, hidden_dim = w1.shape
    output_dim = w3.shape[1]

    cols = _round_up(max(hidden_dim, output_dim, 1), 128)      # lane-padded fan_out
    bias_row = max(cols, _round_up(input_dim, 8))              # sublane-aligned bias row
    rows = bias_row + 8                                        # keep total rows % 8 == 0

    def slab(w, b):
        fan_in, fan_out = w.shape
        s = jnp.zeros((rows, cols), dtype)
        s = s.at[:fan_in, :fan_out].set(w.astype(dtype))
        s = s.at[bias_row, :fan_out].set(jnp.reshape(b, (-1,)).astype(dtype))
        return s

    packed = jnp.stack([slab(w1, b1), slab(w2, b2), slab(w3, b3)], axis=0)
    meta = {"dims": (input_dim, hidden_dim, output_dim), "bias_row": bias_row}
    return packed, meta


def _pick_block_batch(batch, requested):
    """Batch tile: big enough to amortize ~0.35us/step, >=2 even-ish steps when tiled."""
    requested = int(requested)
    if batch <= requested:
        return batch                          # single block == full array dim (always legal)
    # Multi-block: sublane dim must be a multiple of 8; cap so the grid has >= 2
    # roughly even steps (keeps both v7x TensorCores busy under "parallel").
    tb = min(requested, _round_up(pl.cdiv(batch, 2), 8))
    return max(8, (tb // 8) * 8)


def qnetwork_forward(x, packed_params, meta, *, block_batch=4096, out_dtype=jnp.float32,
                     precision=None):
    """Fused 3-layer MLP forward.  x: (batch, input_dim), any float dtype.

    NOTE: with precision=None the MXU uses its default (bf16 multi-pass) f32 path,
    matching jnp.dot on TPU; pass precision=jax.lax.Precision.HIGHEST for tighter
    f32 parity with a CPU reference.
    """
    input_dim, hidden_dim, output_dim = meta["dims"]
    bias_row = meta["bias_row"]
    batch = x.shape[0]
    assert x.shape[1] == input_dim, (x.shape, meta["dims"])

    tb = _pick_block_batch(batch, block_batch)
    grid = (pl.cdiv(batch, tb),)

    kernel = functools.partial(
        _qnetwork_kernel,
        input_dim=input_dim,
        output_dim=output_dim,
        bias_row=bias_row,
        precision=precision,
    )

    flops = 2 * batch * (input_dim * hidden_dim + hidden_dim * hidden_dim
                         + hidden_dim * output_dim)
    bytes_accessed = (x.size * x.dtype.itemsize
                      + packed_params.size * packed_params.dtype.itemsize
                      + batch * output_dim * jnp.dtype(out_dtype).itemsize)

    return pl.pallas_call(
        kernel,
        out_shape=jax.ShapeDtypeStruct((batch, output_dim), out_dtype),
        grid=grid,
        in_specs=[
            # x: one (tb, input_dim) tile per grid step -> double-buffered by Pallas.
            pl.BlockSpec((tb, input_dim), lambda i: (i, 0)),
            # packed params: constant block index -> DMA'd once, VMEM-resident.
            pl.BlockSpec(packed_params.shape, lambda i: (0, 0, 0)),
        ],
        out_specs=pl.BlockSpec((tb, output_dim), lambda i: (i, 0)),
        compiler_params=pltpu.CompilerParams(
            # Independent batch tiles: shard the grid across both TensorCores on v7x.
            dimension_semantics=("parallel",),
            # Explicit scoped-VMEM budget: >= defaults on all gens (v5e default 16 MiB),
            # comfortably holds the 4096-row lane-padded working set (~15 MiB).
            vmem_limit_bytes=32 * 1024 * 1024,
        ),
        cost_estimate=pl.CostEstimate(
            flops=flops, transcendentals=0, bytes_accessed=bytes_accessed),
    )(x, packed_params)


def init_qnetwork_params(key, input_dim, hidden_dim, output_dim, dtype=jnp.float32):
    """PyTorch nn.Linear default init: U(-1/sqrt(fan_in), +1/sqrt(fan_in))."""
    def linear_init(k, fan_in, fan_out):
        kw, kb = jax.random.split(k)
        bound = 1.0 / jnp.sqrt(jnp.asarray(fan_in, dtype))
        w = jax.random.uniform(kw, (fan_in, fan_out), dtype, -bound, bound)
        b = jax.random.uniform(kb, (fan_out,), dtype, -bound, bound)
        return w, b

    k1, k2, k3 = jax.random.split(key, 3)
    w1, b1 = linear_init(k1, input_dim, hidden_dim)
    w2, b2 = linear_init(k2, hidden_dim, hidden_dim)
    w3, b3 = linear_init(k3, hidden_dim, output_dim)
    return (w1, b1, w2, b2, w3, b3)


def reference_forward(x, params):
    w1, b1, w2, b2, w3, b3 = params
    h1 = jnp.maximum(x @ w1 + b1, 0.0)
    h2 = jnp.maximum(h1 @ w2 + b2, 0.0)
    return h2 @ w3 + b3


if __name__ == "__main__":
    # Small shapes consistent with a DQN-style QNetwork (e.g. CartPole: 4 -> 32 -> 32 -> 2).
    input_dim, hidden_dim, output_dim = 4, 32, 2

    key = jax.random.PRNGKey(0)
    k_params, k_x1, k_x2 = jax.random.split(key, 3)

    params = init_qnetwork_params(k_params, input_dim, hidden_dim, output_dim)
    packed_f32, meta = pack_qnetwork_params(params, jnp.float32)   # f32 default (v5e-safe)

    # 1) Small batch, f32, single grid step.
    x_small = jax.random.normal(k_x1, (8, input_dim), dtype=jnp.float32)
    out_small = jax.block_until_ready(qnetwork_forward(x_small, packed_f32, meta))
    ref_small = reference_forward(x_small, params)
    assert out_small.shape == (8, output_dim)
    assert jnp.allclose(out_small, ref_small, atol=1e-5, rtol=1e-5), "f32 single-block mismatch"

    # 2) Larger batch, multi-step batch grid (3 tiles of 64 rows), resident weights.
    x_big = jax.random.normal(k_x2, (192, input_dim), dtype=jnp.float32)
    out_big = jax.block_until_ready(qnetwork_forward(x_big, packed_f32, meta, block_batch=64))
    ref_big = reference_forward(x_big, params)
    assert out_big.shape == (192, output_dim)
    assert jnp.allclose(out_big, ref_big, atol=1e-5, rtol=1e-5), "f32 batch-tiled mismatch"

    # 3) bf16 parameter storage (v6e/v7x); x stays f32 (no wrapper cast), f32 accumulation.
    packed_bf16, _ = pack_qnetwork_params(params, jnp.bfloat16)
    out_bf16 = jax.block_until_ready(qnetwork_forward(x_big, packed_bf16, meta, block_batch=64))
    assert out_bf16.shape == (192, output_dim)
    assert jnp.allclose(out_bf16, ref_big, atol=1e-1, rtol=1e-1), "bf16 storage mismatch"

    print("KERNEL_OK")
</pallas_src>

<mosaic_0001>
module attributes {stable_mosaic.version = 11 : i64} {
  func.func @_qnetwork_kernel(%arg0: i32, %arg1: memref<8x4xf32, #tpu.memory_space<vmem>>, %arg2: memref<3x136x128xf32, #tpu.memory_space<vmem>>, %arg3: memref<8x2xf32, #tpu.memory_space<vmem>>) attributes {dimension_semantics = [#tpu.dimension_semantics<parallel>], iteration_bounds = array<i64: 1>, scalar_prefetch = 0 : i64, scratch_operands = 0 : i64, tpu.core_type = #tpu.core_type<tc>, window_params = [{transform_indices = @transform_0, window_bounds = array<i64: 8, 4>}, {pipeline_mode = #tpu.pipeline_mode<synchronous>, transform_indices = @transform_1, window_bounds = array<i64: 3, 136, 128>}, {transform_indices = @transform_2, window_bounds = array<i64: 8, 2>}]} {
    %c0 = arith.constant 0 : index
    %c0_0 = arith.constant 0 : index
    %0 = vector.load %arg1[%c0, %c0_0] : memref<8x4xf32, #tpu.memory_space<vmem>>, vector<8x4xf32>
    %c0_1 = arith.constant 0 : index
    %c0_2 = arith.constant 0 : index
    %c0_3 = arith.constant 0 : index
    %1 = vector.load %arg2[%c0_1, %c0_2, %c0_3] : memref<3x136x128xf32, #tpu.memory_space<vmem>>, vector<1x136x128xf32>
    %2 = vector.shape_cast %1 : vector<1x136x128xf32> to vector<136x128xf32>
    %3 = vector.extract_strided_slice %2 {offsets = [0, 0], sizes = [4, 128], strides = [1, 1]} : vector<136x128xf32> to vector<4x128xf32>
    %4 = vector.extract_strided_slice %2 {offsets = [128, 0], sizes = [1, 128], strides = [1, 1]} : vector<136x128xf32> to vector<1x128xf32>
    %cst = arith.constant dense<0.000000e+00> : vector<8x128xf32>
    %5 = tpu.matmul %0, %3, %cst {dimension_numbers = #tpu.dot_dimension_numbers<[1], [0], [0], [1], [0, 0, 1, 1], [], []>} : vector<8x4xf32>, vector<4x128xf32>, vector<8x128xf32> -> vector<8x128xf32>
    %6 = vector.broadcast %4 : vector<1x128xf32> to vector<8x128xf32>
    %7 = arith.addf %5, %6 : vector<8x128xf32>
    %cst_4 = arith.constant 0.000000e+00 : f32
    %8 = vector.broadcast %cst_4 : f32 to vector<8x128xf32>
    %9 = arith.maximumf %7, %8 : vector<8x128xf32>
    %c1 = arith.constant 1 : index
    %c0_5 = arith.constant 0 : index
    %c0_6 = arith.constant 0 : index
    %10 = vector.load %arg2[%c1, %c0_5, %c0_6] : memref<3x136x128xf32, #tpu.memory_space<vmem>>, vector<1x136x128xf32>
    %11 = vector.shape_cast %10 : vector<1x136x128xf32> to vector<136x128xf32>
    %12 = vector.extract_strided_slice %11 {offsets = [0, 0], sizes = [128, 128], strides = [1, 1]} : vector<136x128xf32> to vector<128x128xf32>
    %13 = vector.extract_strided_slice %11 {offsets = [128, 0], sizes = [1, 128], strides = [1, 1]} : vector<136x128xf32> to vector<1x128xf32>
    %cst_7 = arith.constant dense<0.000000e+00> : vector<8x128xf32>
    %14 = tpu.matmul %9, %12, %cst_7 {dimension_numbers = #tpu.dot_dimension_numbers<[1], [0], [0], [1], [0, 0, 1, 1], [], []>} : vector<8x128xf32>, vector<128x128xf32>, vector<8x128xf32> -> vector<8x128xf32>
    %15 = vector.broadcast %13 : vector<1x128xf32> to vector<8x128xf32>
    %16 = arith.addf %14, %15 : vector<8x128xf32>
    %cst_8 = arith.constant 0.000000e+00 : f32
    %17 = vector.broadcast %cst_8 : f32 to vector<8x128xf32>
    %18 = arith.maximumf %16, %17 : vector<8x128xf32>
    %c2 = arith.constant 2 : index
    %c0_9 = arith.constant 0 : index
    %c0_10 = arith.constant 0 : index
    %19 = vector.load %arg2[%c2, %c0_9, %c0_10] : memref<3x136x128xf32, #tpu.memory_space<vmem>>, vector<1x136x128xf32>
    %20 = vector.shape_cast %19 : vector<1x136x128xf32> to vector<136x128xf32>
    %21 = vector.extract_strided_slice %20 {offsets = [0, 0], sizes = [128, 128], strides = [1, 1]} : vector<136x128xf32> to vector<128x128xf32>
    %22 = vector.extract_strided_slice %20 {offsets = [128, 0], sizes = [1, 128], strides = [1, 1]} : vector<136x128xf32> to vector<1x128xf32>
    %cst_11 = arith.constant dense<0.000000e+00> : vector<8x128xf32>
    %23 = tpu.matmul %18, %21, %cst_11 {dimension_numbers = #tpu.dot_dimension_numbers<[1], [0], [0], [1], [0, 0, 1, 1], [], []>} : vector<8x128xf32>, vector<128x128xf32>, vector<8x128xf32> -> vector<8x128xf32>
    %24 = vector.broadcast %22 : vector<1x128xf32> to vector<8x128xf32>
    %25 = arith.addf %23, %24 : vector<8x128xf32>
    %26 = vector.extract_strided_slice %25 {offsets = [0, 0], sizes = [8, 2], strides = [1, 1]} : vector<8x128xf32> to vector<8x2xf32>
    %c0_12 = arith.constant 0 : index
    %c0_13 = arith.constant 0 : index
    %27 = vector.load %arg3[%c0_12, %c0_13] : memref<8x2xf32, #tpu.memory_space<vmem>>, vector<8x2xf32>
    tpu.vector_store %arg3[%c0_12, %c0_13], %26 {strides = array<i32>} : memref<8x2xf32, #tpu.memory_space<vmem>>, vector<8x2xf32>,
    return
  }
  func.func @transform_0(%arg0: i32) -> (i32, i32) {
    %c0_i32 = arith.constant 0 : i32
    %c0_i32_0 = arith.constant 0 : i32
    return %arg0, %c0_i32 : i32, i32
  }
  func.func @transform_1(%arg0: i32) -> (i32, i32, i32) {
    %c0_i32 = arith.constant 0 : i32
    %c0_i32_0 = arith.constant 0 : i32
    %c0_i32_1 = arith.constant 0 : i32
    %c0_i32_2 = arith.constant 0 : i32
    return %c0_i32, %c0_i32_0, %c0_i32_1 : i32, i32, i32
  }
  func.func @transform_2(%arg0: i32) -> (i32, i32) {
    %c0_i32 = arith.constant 0 : i32
    %c0_i32_0 = arith.constant 0 : i32
    return %arg0, %c0_i32 : i32, i32
  }
}

</mosaic_0001>

<bundles_post_ra>
// kernel: tpu_custom_call.1
= control target key start
LH: loop header
LB: loop body
LE: loop exit
PB: predicated region body
PF: predicated region fallthrough
CT: control target
= control target key end

     0   :  { %7 = vsyncpa [#allocation3], 0  ;;  %s177_s12 = smov [#allocation2]   ;;  %s178_s14 = smov 128   ;;  %s204_s0 = inlined_call_operand.vmem [shape: f32[8,4], index: 0, kind: input, shape index: {}]   ;;  %s205_s1 = inlined_call_operand.hbm [shape: f32[3,136,128], index: 1, kind: input, shape index: {}]   ;;  %s206_s2 = inlined_call_operand.vmem [shape: f32[8,2], index: 2, kind: output, shape index: {}]  }
   0x1   :  { %s14_s11 = sshll.u32 %s205_s1, 4  ;;  %s16_s13 = sshll.u32 %s177_s12, 4  ;;  %s15_s11 = int_to_ptr.hbm [resolvable:$true] %s14_s11  ;;  %s17_s13 = int_to_ptr.vmem [resolvable:$true] %s16_s13 }
   0x2   :  { %s179_s15 = smov 8  }
   0x3   :  { %22 = dma.hbm_to_vmem [thread:$0]  %s15_s11, 6528, %s17_s13, [#allocation3], %s178_s14, %s178_s14, %s179_s15  }
   0x4   :  { %175 = dma.done.wait [#allocation3], 6528  }
   0x5   :  { %176 = vsyncadd [#allocation3], 4294960768  ;;  %vm35_vm0 = vcmask 1043456   ;;  %vm31_vm1 = vcmask 31744   ;;  %v28_v0 = vld [vmem:[#allocation2] sm:$0xff]  ;;  %v75_v3 = vld [vmem:[#allocation2 + $0xf8] sm:$0xff] }
   0x6   :  { %v27_v1 = vld [vmem:[%s204_s0] sm:$0xff]  ;;  %146 = vmatpush.msk.msra.mxu0 %vm35_vm0, %v28_v0  ;;  %v74_v4 = vld [vmem:[#allocation2 + $0xf0] sm:$0xff]  ;;  %v73_v5 = vld [vmem:[#allocation2 + $0xe8] sm:$0xff]  ;;  %vm139_vm2 = vcmask 15360  }
   0x7   :  { %v76_v2 = vld [vmem:[#allocation2 + $0x100] sm:$0xff]  ;;  %147 = vmatmul.msk.f32.vlgmr.msra.gmra.mxu0 %vm31_vm1, %v27_v1  ;;  %v71_v7 = vld [vmem:[#allocation2 + $0xd8] sm:$0xff]  ;;  %v70_v8 = vld [vmem:[#allocation2 + $0xd0] sm:$0xff] }
   0x8   :  { %79 = vmatpush.msra.mxu1 %v76_v2  ;;  %v72_v6 = vld [vmem:[#allocation2 + $0xe0] sm:$0xff]  ;;  %v69_v9 = vld [vmem:[#allocation2 + $0xc8] sm:$0xff]  ;;  %v67_v11 = vld [vmem:[#allocation2 + $0xb8] sm:$0xff] }
   0x9   :  { %v68_v10 = vld [vmem:[#allocation2 + $0xc0] sm:$0xff]  ;;  %v66_v12 = vld [vmem:[#allocation2 + $0xb0] sm:$0xff]  ;;  %v65_v13 = vld [vmem:[#allocation2 + $0xa8] sm:$0xff] }
   0xa   :  { %80 = vmatpush.msra.mxu1 %v75_v3  ;;  %v64_v14 = vld [vmem:[#allocation2 + $0xa0] sm:$0xff]  ;;  %v63_v15 = vld [vmem:[#allocation2 + $0x98] sm:$0xff]  ;;  %v62_v16 = vld [vmem:[#allocation2 + $0x90] sm:$0xff] }
   0xb   :  { %v61_v17 = vld [vmem:[#allocation2 + $0x88] sm:$0xff]  ;;  %v115_v19 = vld [vmem:[#allocation2 + $0x180] sm:$0xff]  ;;  %v114_v20 = vld [vmem:[#allocation2 + $0x178] sm:$0xff] }
   0xc   :  { %81 = vmatpush.msra.mxu1 %v74_v4  ;;  %v116_v18 = vld [vmem:[#allocation2 + $0x188] sm:$0xff]  ;;  %v113_v21 = vld [vmem:[#allocation2 + $0x170] sm:$0xff]  ;;  %v111_v23 = vld [vmem:[#allocation2 + $0x160] sm:$0xff] }
   0xd   :  { %119 = vmatpush.msra.mxu2 %v116_v18  ;;  %v112_v22 = vld [vmem:[#allocation2 + $0x168] sm:$0xff]  ;;  %v110_v24 = vld [vmem:[#allocation2 + $0x158] sm:$0xff]  ;;  %v109_v25 = vld [vmem:[#allocation2 + $0x150] sm:$0xff] }
   0xe   :  { %82 = vmatpush.msra.mxu1 %v73_v5  ;;  %v108_v26 = vld [vmem:[#allocation2 + $0x148] sm:$0xff]  ;;  %v107_v27 = vld [vmem:[#allocation2 + $0x140] sm:$0xff]  ;;  %v106_v28 = vld [vmem:[#allocation2 + $0x138] sm:$0xff] }
   0xf   :  { %120 = vmatpush.msra.mxu2 %v115_v19  ;;  %v105_v29 = vld [vmem:[#allocation2 + $0x130] sm:$0xff]  ;;  %v29_v30 = vld [vmem:[#allocation2 + $0x80] sm:$0xff]  ;;  %v104_v31 = vld [vmem:[#allocation2 + $0x128] sm:$0xff] }
  0x10   :  { %83 = vmatpush.msra.mxu1 %v72_v6  ;;  %v30_v32 = vperm.slane %v29_v30, 0  ;;  %v103_v36 = vld [vmem:[#allocation2 + $0x120] sm:$0xff]  ;;  %v102_v37 = vld [vmem:[#allocation2 + $0x118] sm:$0xff]  ;;  %v101_v38 = vld [vmem:[#allocation2 + $0x110] sm:$0xff] }
  0x11   :  { %121 = vmatpush.msra.mxu2 %v114_v20  ;;  %v77_v39 = vld [vmem:[#allocation2 + $0x108] sm:$0xff]  ;;  %v117_v44 = vld [vmem:[#allocation2 + $0x190] sm:$0xff] }
  0x12   :  { %84 = vmatpush.msra.mxu1 %v71_v7  ;;  %v78_v40 = vperm.slane %v77_v39, 0  ;;  %v118_v45 = vperm.slane %v117_v44, 0 }
  0x13   :  { %122 = vmatpush.msra.mxu2 %v113_v21 }
  0x14   :  { %85 = vmatpush.msra.mxu1 %v70_v8 }
  0x15   :  { %123 = vmatpush.msra.mxu2 %v112_v22 }
  0x16   :  { %86 = vmatpush.msra.mxu1 %v69_v9 }
  0x17   :  { %124 = vmatpush.msra.mxu2 %v111_v23 }
  0x18   :  { %87 = vmatpush.msra.mxu1 %v68_v10 }
  0x19   :  { %125 = vmatpush.msra.mxu2 %v110_v24 }
  0x1a   :  { %88 = vmatpush.msra.mxu1 %v67_v11 }
  0x1b   :  { %126 = vmatpush.msra.mxu2 %v109_v25 }
  0x1c   :  { %89 = vmatpush.msra.mxu1 %v66_v12 }
  0x1d   :  { %127 = vmatpush.msra.mxu2 %v108_v26 }
  0x1e   :  { %90 = vmatpush.msra.mxu1 %v65_v13 }
  0x1f   :  { %128 = vmatpush.msra.mxu2 %v107_v27 }
  0x20   :  { %91 = vmatpush.msra.mxu1 %v64_v14 }
  0x21   :  { %129 = vmatpush.msra.mxu2 %v106_v28 }
  0x22   :  { %92 = vmatpush.msra.mxu1 %v63_v15 }
  0x23   :  { %130 = vmatpush.msra.mxu2 %v105_v29 }
  0x24   :  { %93 = vmatpush.msra.mxu1 %v62_v16 }
  0x25   :  { %131 = vmatpush.msra.mxu2 %v104_v31 }
  0x26   :  { %94 = vmatpush.msra.mxu1 %v61_v17 }
  0x27   :  { %132 = vmatpush.msra.mxu2 %v103_v36 }
  0x29   :  { %133 = vmatpush.msra.mxu2 %v102_v37 }
  0x2b   :  { %134 = vmatpush.msra.mxu2 %v101_v38 }
  0x84   :  { %v56_v33 = vpop.f32.mrf.mxu0 }
  0x85   :  { %v57_v34 = vadd.f32 %v56_v33, %v30_v32 }
  0x87   :  { %v59_v35 = vmax.f32 %v57_v34, 0.0 }
  0x89   :  { %95 = vmatmul.f32.vlgmr.msra.gmra.mxu1 %v59_v35 }
 0x106   :  { %v96_v41 = vpop.f32.mrf.mxu1 }
 0x107   :  { %v97_v42 = vadd.f32 %v96_v41, %v78_v40 }
 0x109   :  { %v99_v43 = vmax.f32 %v97_v42, 0.0 }
 0x10b   :  { %135 = vmatmul.f32.vlgmr.msra.gmra.mxu2 %v99_v43 }
 0x18e   :  { %v136_v46 = vpop.f32.mrf.mxu2 }
 0x18f   :  { %v137_v47 = vadd.f32 %v136_v46, %v118_v45 }
 0x191   :  { %140 = vst.msk [vmem:[%s206_s2] sm:$0xff] %vm139_vm2, %v137_v47 }
 0x192   :  { %145 = vsyncpa [#allocation3], 1 }

</bundles_post_ra>
